<compile_context>
chip_gen: v7x
topology: tpu7x:2x2x1
jax: 0.10.0
libtpu: 0.0.40
codegen_flags: <defaults>
</compile_context>

<pallas_src>
import functools
import math

import jax
import jax.numpy as jnp
from jax.experimental import pallas as pl
from jax.experimental.pallas import tpu as pltpu


def _round_up(x: int, m: int) -> int:
    return ((x + m - 1) // m) * m


def _one_hot_packed_kernel(types_ref, sel_ref, cls_ref, out_ref):
    """Node-major packed one-hot.

    types_ref: (tile_rows, pack) int32   packed node type ids
    sel_ref:   (pack, lanes)     f32     sel[k, c] = 1.0 if c // num_types == k
    cls_ref:   (1, lanes)        f32     cls[0, c] = c % num_types
    out_ref:   (tile_rows, lanes) out_dtype

    Output column c of packed row r holds node r*pack + c//num_types,
    class c % num_types, so the wrapper's reshape back to (N, num_types) is a
    free row-major view.  The lane expansion (replicating each packed id across
    its num_types lanes) runs on the otherwise-idle MXU; the only VPU work is
    one compare per output vreg, leaving the kernel HBM-store-bound.
    """
    t = types_ref[...].astype(jnp.float32)                               # (rows, pack)
    t_exp = jnp.dot(t, sel_ref[...], preferred_element_type=jnp.float32)  # (rows, lanes)
    out_ref[...] = (t_exp == cls_ref[...]).astype(out_ref.dtype)          # lane-dense vst


def one_hot_atom_encoding(node_types: jax.Array,
                          num_types: int,
                          out_dtype=jnp.float32,
                          *,
                          tile_rows: int = 512) -> jax.Array:
    """node_types: (N,) or (N, 1) integer array -> (N, num_types) one-hot in out_dtype."""
    if node_types.ndim == 2:
        node_types = node_types[:, 0]          # squeeze(-1)
    node_types = node_types.astype(jnp.int32)
    n = node_types.shape[0]

    # --- pack selection: make lanes = pack*num_types an exact multiple of 128
    # (fully unmasked stores) when that keeps lanes <= 1024; otherwise fall back
    # to >=128 lanes with a partially masked trailing vreg column.
    if num_types >= 128:
        pack = 1
    else:
        pack_exact = 128 // math.gcd(num_types, 128)   # lcm(num_types,128)/num_types
        if pack_exact * num_types <= 1024:
            pack = pack_exact
        else:
            pack = pl.cdiv(128, num_types)
    lanes = pack * num_types

    rows = pl.cdiv(n, pack)
    n_pad = rows * pack
    if n_pad != n:
        # Pad only to a multiple of `pack` (< pack extra int32s). Padded nodes
        # become class-0 rows in the packed output and are dropped by the final
        # [:n] slice; do not consume out_packed directly.
        node_types = jnp.pad(node_types, (0, n_pad - n))
    types2d = node_types.reshape(rows, pack)            # free row-major view

    itemsize = jnp.dtype(out_dtype).itemsize
    sublane_mult = {4: 8, 2: 16, 1: 32}.get(itemsize, 8)

    # Big tiles (store-bound op), but keep >=4 grid steps when rows allow so the
    # "parallel" grid axis can shard across both TensorCores on v7x.
    tile_rows = min(tile_rows, _round_up(pl.cdiv(rows, 4), sublane_mult))
    tile_rows = _round_up(max(tile_rows, sublane_mult), sublane_mult)

    grid = (pl.cdiv(rows, tile_rows),)                  # ragged last block clipped by Pallas

    # Constant helper tensors (shape-only, tiny; constant-folded under jit).
    lane_idx = jnp.arange(lanes, dtype=jnp.int32)
    sel = (lane_idx[None, :] // num_types
           == jnp.arange(pack, dtype=jnp.int32)[:, None]).astype(jnp.float32)  # (pack, lanes)
    cls = (lane_idx % num_types).astype(jnp.float32)[None, :]                  # (1, lanes)

    cost = pl.CostEstimate(
        flops=0,
        transcendentals=0,
        bytes_accessed=int(4 * rows * pack + rows * lanes * itemsize
                           + (pack + 1) * lanes * 4),
    )

    out_packed = pl.pallas_call(
        _one_hot_packed_kernel,
        out_shape=jax.ShapeDtypeStruct((rows, lanes), out_dtype),
        grid=grid,
        in_specs=[
            pl.BlockSpec((tile_rows, pack), lambda i: (i, 0)),
            pl.BlockSpec((pack, lanes), lambda i: (0, 0)),   # constant block, fetched once
            pl.BlockSpec((1, lanes), lambda i: (0, 0)),      # constant block, fetched once
        ],
        out_specs=pl.BlockSpec((tile_rows, lanes), lambda i: (i, 0)),
        compiler_params=pltpu.CompilerParams(
            dimension_semantics=("parallel",)),              # megacore sharding on v7x
        cost_estimate=cost,
    )(types2d, sel, cls)

    # Free row-major view back to (N, num_types); slice off the (< pack) padded
    # nodes only when padding was actually added.
    flat = out_packed.reshape(n_pad, num_types)
    return flat if n_pad == n else flat[:n]


class OneHotAtomEncoding:
    """JAX/Pallas port of geqtrain's OneHotAtomEncoding module (forward pass only)."""

    def __init__(self, num_types: int, set_features: bool = True,
                 min_pallas_nodes: int = 2048):
        # TODO(synk): e3nn Irreps bookkeeping (_init_irreps) is metadata-only and is
        # not reproduced here.
        self.num_types = num_types
        self.set_features = set_features
        # For small graphs the fixed pallas_call launch + extra HBM round-trip
        # exceeds a fused XLA broadcast-compare, so fall back to jax.nn.one_hot.
        # If the one-hot directly feeds an embedding matmul, prefer a row gather
        # of the weight matrix instead of materializing the one-hot at all.
        self.min_pallas_nodes = min_pallas_nodes

    def __call__(self, data: dict) -> dict:
        if data.get("node_attrs", None) is None:
            type_numbers = data["node_types"]            # (N, 1) or (N,) int
            pos_dtype = data["pos"].dtype                # one-hot cast to positions dtype
            n = type_numbers.shape[0]
            if n < self.min_pallas_nodes:
                tn = type_numbers[:, 0] if type_numbers.ndim == 2 else type_numbers
                one_hot = jax.nn.one_hot(tn, self.num_types, dtype=pos_dtype)
            else:
                one_hot = one_hot_atom_encoding(type_numbers, self.num_types, pos_dtype)
            data["node_attrs"] = one_hot
            if self.set_features:
                data["node_features"] = one_hot
        return data


if __name__ == "__main__":
    key = jax.random.PRNGKey(0)
    k_types, k_pos, k_types2, k_types3 = jax.random.split(key, 4)

    # Case 1: small graph, f32 positions, via the module, forcing the Pallas path.
    num_nodes, num_types = 16, 8
    node_types = jax.random.randint(k_types, (num_nodes, 1), 0, num_types,
                                    dtype=jnp.int32)
    pos = jax.random.normal(k_pos, (num_nodes, 3), dtype=jnp.float32)
    data = {"node_types": node_types, "pos": pos, "node_attrs": None}

    module = OneHotAtomEncoding(num_types=num_types, set_features=True,
                                min_pallas_nodes=0)
    out = module(data)
    attrs = jax.block_until_ready(out["node_attrs"])
    feats = jax.block_until_ready(out["node_features"])

    ref = jax.nn.one_hot(node_types[:, 0], num_types, dtype=pos.dtype)
    assert attrs.shape == (num_nodes, num_types)
    assert attrs.dtype == pos.dtype
    assert jnp.array_equal(attrs, ref)
    assert jnp.array_equal(feats, ref)

    # Case 2: ragged node count + bf16 output (tests pack-padding/slice and bf16 store).
    n2, t2 = 100, 8
    types2 = jax.random.randint(k_types2, (n2,), 0, t2, dtype=jnp.int32)
    oh2 = jax.block_until_ready(one_hot_atom_encoding(types2, t2, jnp.bfloat16))
    ref2 = jax.nn.one_hot(types2, t2, dtype=jnp.bfloat16)
    assert oh2.shape == (n2, t2) and oh2.dtype == jnp.bfloat16
    assert jnp.array_equal(oh2.astype(jnp.float32), ref2.astype(jnp.float32))

    # Case 3: multi-step grid with a ragged last block (exercises cdiv-grid clipping).
    n3, t3 = 1000, 8
    types3 = jax.random.randint(k_types3, (n3,), 0, t3, dtype=jnp.int32)
    oh3 = jax.block_until_ready(one_hot_atom_encoding(types3, t3, jnp.float32))
    ref3 = jax.nn.one_hot(types3, t3, dtype=jnp.float32)
    assert oh3.shape == (n3, t3)
    assert jnp.array_equal(oh3, ref3)

    print("KERNEL_OK")
</pallas_src>

<mosaic_0001>
module attributes {stable_mosaic.version = 11 : i64} {
  func.func @_one_hot_packed_kernel(%arg0: i32, %arg1: memref<8x16xi32, #tpu.memory_space<vmem>>, %arg2: memref<16x128xf32, #tpu.memory_space<vmem>>, %arg3: memref<1x128xf32, #tpu.memory_space<vmem>>, %arg4: memref<8x128xf32, #tpu.memory_space<vmem>>) attributes {dimension_semantics = [#tpu.dimension_semantics<parallel>], iteration_bounds = array<i64: 1>, scalar_prefetch = 0 : i64, scratch_operands = 0 : i64, tpu.core_type = #tpu.core_type<tc>, window_params = [{transform_indices = @transform_0, window_bounds = array<i64: 8, 16>}, {pipeline_mode = #tpu.pipeline_mode<synchronous>, transform_indices = @transform_1, window_bounds = array<i64: 16, 128>}, {pipeline_mode = #tpu.pipeline_mode<synchronous>, transform_indices = @transform_2, window_bounds = array<i64: 1, 128>}, {transform_indices = @transform_3, window_bounds = array<i64: 8, 128>}]} {
    %c0 = arith.constant 0 : index
    %c0_0 = arith.constant 0 : index
    %0 = vector.load %arg1[%c0, %c0_0] : memref<8x16xi32, #tpu.memory_space<vmem>>, vector<8x16xi32>
    %1 = arith.sitofp %0 : vector<8x16xi32> to vector<8x16xf32>
    %c0_1 = arith.constant 0 : index
    %c0_2 = arith.constant 0 : index
    %2 = vector.load %arg2[%c0_1, %c0_2] : memref<16x128xf32, #tpu.memory_space<vmem>>, vector<16x128xf32>
    %cst = arith.constant dense<0.000000e+00> : vector<8x128xf32>
    %3 = tpu.matmul %1, %2, %cst {dimension_numbers = #tpu.dot_dimension_numbers<[1], [0], [0], [1], [0, 0, 1, 1], [], []>} : vector<8x16xf32>, vector<16x128xf32>, vector<8x128xf32> -> vector<8x128xf32>
    %c0_3 = arith.constant 0 : index
    %c0_4 = arith.constant 0 : index
    %4 = vector.load %arg3[%c0_3, %c0_4] : memref<1x128xf32, #tpu.memory_space<vmem>>, vector<1x128xf32>
    %5 = vector.broadcast %4 : vector<1x128xf32> to vector<8x128xf32>
    %6 = arith.cmpf oeq, %3, %5 : vector<8x128xf32>
    %7 = arith.extui %6 : vector<8x128xi1> to vector<8x128xi32>
    %8 = arith.sitofp %7 : vector<8x128xi32> to vector<8x128xf32>
    %c0_5 = arith.constant 0 : index
    %c0_6 = arith.constant 0 : index
    %9 = vector.load %arg4[%c0_5, %c0_6] : memref<8x128xf32, #tpu.memory_space<vmem>>, vector<8x128xf32>
    tpu.vector_store %arg4[%c0_5, %c0_6], %8 {strides = array<i32>} : memref<8x128xf32, #tpu.memory_space<vmem>>, vector<8x128xf32>,
    return
  }
  func.func @transform_0(%arg0: i32) -> (i32, i32) {
    %c0_i32 = arith.constant 0 : i32
    %c0_i32_0 = arith.constant 0 : i32
    return %arg0, %c0_i32 : i32, i32
  }
  func.func @transform_1(%arg0: i32) -> (i32, i32) {
    %c0_i32 = arith.constant 0 : i32
    %c0_i32_0 = arith.constant 0 : i32
    %c0_i32_1 = arith.constant 0 : i32
    return %c0_i32, %c0_i32_0 : i32, i32
  }
  func.func @transform_2(%arg0: i32) -> (i32, i32) {
    %c0_i32 = arith.constant 0 : i32
    %c0_i32_0 = arith.constant 0 : i32
    %c0_i32_1 = arith.constant 0 : i32
    return %c0_i32, %c0_i32_0 : i32, i32
  }
  func.func @transform_3(%arg0: i32) -> (i32, i32) {
    %c0_i32 = arith.constant 0 : i32
    %c0_i32_0 = arith.constant 0 : i32
    return %arg0, %c0_i32 : i32, i32
  }
}

</mosaic_0001>

<bundles_post_ra>
// kernel: tpu_custom_call.1
= control target key start
LH: loop header
LB: loop body
LE: loop exit
PB: predicated region body
PF: predicated region fallthrough
CT: control target
= control target key end

     0   :  { %8 = vsyncpa [#allocation3], 0  ;;  %s323_s0 = inlined_call_operand.hbm [shape: s32[1,16], index: 0, kind: input, shape index: {}]   ;;  %s324_s1 = inlined_call_operand.hbm [shape: f32[16,128], index: 1, kind: input, shape index: {}]   ;;  %s325_s2 = inlined_call_operand.vmem [shape: f32[1,128], index: 2, kind: input, shape index: {}]   ;;  %s326_s3 = inlined_call_operand.hbm [shape: f32[1,128], index: 3, kind: output, shape index: {}]  }
   0x1   :  { %9 = vsyncpa [#allocation6], 0 }
   0x2   :  { %10 = vsyncpa [#allocation4], 0 }
   0x3   :  { %15 = vsyncadd [#allocation3], 112  ;;  %s248_s12 = smov [#allocation2]   ;;  %s176_s16 = scalar_lea.hbm %s323_s0, 16 }
   0x4   :  { %s16_s13 = sshll.u32 %s248_s12, 4  ;;  %p177_p0 = scmp.ne.s32.totalorder %s323_s0, %s176_s16  ;;  %s17_s13 = int_to_ptr.vmem [resolvable:$true] %s16_s13 }
   0x5   :  { %p180_p1 = scmp.lt.u32.totalorder %s176_s16, %s323_s0 }
   0x7   :  { %p182_p2 = pnand %p180_p1, %p177_p0 }
   0x9   :  { %185 = shalt.err (!%p182_p2)
}
   0xa   :  { %s186_s21 = scalar_lea.vmem %s17_s13, 16  ;;  %s190_s22 = scalar_lea.vmem %s17_s13, 128 }
   0xb   :  { %p187_p3 = scmp.ne.s32.totalorder %s17_s13, %s186_s21  ;;  %p191_p4 = scmp.lt.s32.totalorder %s17_s13, %s17_s13 }
   0xc   :  { %p192_p5 = scmp.lt.s32.totalorder %s190_s22, %s186_s21 }
   0xe   :  { %p193_p6 = por %p192_p5, %p191_p4 }
  0x10   :  { %p194_p7 = pnand %p193_p6, %p187_p3 }
  0x12   :  { %197 = shalt.err (!%p194_p7)
}
  0x13   :  { %s249_s23 = smov 16   ;;  %s250_s24 = smov 1  }
  0x14   :  { %22 = dma.hbm_to_vmem [thread:$0]  %s323_s0, 16, %s17_s13, [#allocation3], %s249_s23, %s249_s23, %s250_s24  }
  0x15   :  { %s251_s27 = smov [#allocation5]   ;;  %s198_s4 = scalar_lea.hbm %s324_s1, 256 }
  0x16   :  { %s28_s28 = sshll.u32 %s251_s27, 4  ;;  %p199_p8 = scmp.ne.s32.totalorder %s324_s1, %s198_s4  ;;  %s29_s28 = int_to_ptr.vmem [resolvable:$true] %s28_s28 }
  0x17   :  { %p202_p9 = scmp.lt.u32.totalorder %s198_s4, %s324_s1 }
  0x19   :  { %p204_p10 = pnand %p202_p9, %p199_p8 }
  0x1b   :  { %207 = shalt.err (!%p204_p10)
}
  0x1c   :  { %s208_s9 = scalar_lea.vmem %s29_s28, 256  ;;  %p213_p12 = scmp.lt.s32.totalorder %s29_s28, %s29_s28 }
  0x1d   :  { %p209_p11 = scmp.ne.s32.totalorder %s29_s28, %s208_s9  ;;  %p214_p13 = scmp.lt.s32.totalorder %s208_s9, %s208_s9 }
  0x1f   :  { %p215_p0 = por %p214_p13, %p213_p12 }
  0x21   :  { %p216_p1 = pnand %p215_p0, %p209_p11 }
  0x23   :  { %219 = shalt.err (!%p216_p1)
}
  0x24   :  { %s252_s0 = smov 128   ;;  %s253_s10 = smov 8  }
  0x25   :  { %34 = dma.hbm_to_vmem [thread:$0]  %s324_s1, 256, %s29_s28, [#allocation6], %s252_s0, %s252_s0, %s253_s10  }
  0x26   :  { %242 = dma.done.wait [#allocation3], 128  }
  0x27   :  { %243 = vsyncadd [#allocation3], 4294967168 }
  0x28   :  { %244 = dma.done.wait [#allocation6], 256  }
  0x29   :  { %245 = vsyncadd [#allocation6], 4294967040  ;;  %v254_v0 = vmov 0.0|0.0   ;;  %vm255_vm0 = vmmov 0   ;;  %v256_v1 = vmov 0.0   ;;  %v45_v2 = vld [vmem:[#allocation5] sm:$0xff] }
  0x2a   :  { %163 = vmatprep.subr.bf16.mxu0 %v254_v0  ;;  %160 = vmatprep.mubr.msk.f32.mxu0 %vm255_vm0, %v256_v1  ;;  %v46_v3 = vld [vmem:[#allocation5 + $0x8] sm:$0xff]  ;;  %v43_v4 = vld [vmem:[#allocation2] sm:$0xff]  ;;  %vm47_vm1 = vcmask 130048  }
  0x2b   :  { %v164_v5 = vpack.c.bf16 %v46_v3, %v45_v2  ;;  %v44_v6 = vcvt.s32.f32 %v43_v4  ;;  %v151_v7 = vld [vmem:[%s325_s2] ss:$0 sm:$0xff] }
  0x2d   :  { %165 = vmatpush3.bf16.msra.mxu0 %v164_v5 }
  0x30   :  { %161 = vmatmul.mubr.msk.f32.vlgmr.msra.gmra.mrb[0].mxu0 %vm47_vm1, %v44_v6 }
 0x103   :  { %v117_v8 = vpop.f32.mrb[0].mxu0 }
 0x104   :  { %vm128_vm2 = vcmp.eq.f32.partialorder %v117_v8, %v151_v7  ;;  %v162_v9 = vpop.f32.mrb[1].mxu0 }
 0x105   :  { %v152_v10 = vsel %vm128_vm2, 1.0, %v256_v1 }
 0x106   :  { %131 = vst [vmem:[#allocation7] sm:$0xff] %v152_v10 }
 0x107   :  { %136 = vsyncadd [#allocation4], 112  ;;  %s257_s1 = smov [#allocation7]  }
 0x108   :  { %s137_s15 = sshll.u32 %s257_s1, 4  ;;  %s138_s15 = int_to_ptr.vmem [resolvable:$true] %s137_s15 }
 0x109   :  { %s220_s16 = scalar_lea.vmem %s138_s15, 16  ;;  %s224_s17 = scalar_lea.vmem %s138_s15, 128 }
 0x10a   :  { %p221_p2 = scmp.ne.s32.totalorder %s138_s15, %s220_s16  ;;  %p225_p3 = scmp.lt.s32.totalorder %s138_s15, %s138_s15 }
 0x10b   :  { %p226_p4 = scmp.lt.s32.totalorder %s224_s17, %s220_s16 }
 0x10d   :  { %p227_p5 = por %p226_p4, %p225_p3 }
 0x10f   :  { %p228_p6 = pnand %p227_p5, %p221_p2 }
 0x111   :  { %231 = shalt.err (!%p228_p6)
}
 0x112   :  { %s232_s2 = scalar_lea.hbm %s326_s3, 16 }
 0x113   :  { %p233_p7 = scmp.ne.s32.totalorder %s326_s3, %s232_s2  ;;  %p236_p8 = scmp.lt.u32.totalorder %s232_s2, %s326_s3 }
 0x115   :  { %p238_p9 = pnand %p236_p8, %p233_p7 }
 0x117   :  { %241 = shalt.err (!%p238_p9)
}
 0x118   :  { %143 = dma.vmem_to_hbm [thread:$0]  %s138_s15, 16, %s326_s3, [#allocation4], %s249_s23, %s249_s23, %s250_s24  }
 0x119   :  { %246 = dma.done.wait [#allocation4], 128  }
 0x11a   :  { %247 = vsyncadd [#allocation4], 4294967168 }
 0x11b   :  { %147 = vsyncpa [#allocation3], 1 }
 0x11c   :  { %148 = vsyncpa [#allocation6], 1 }
 0x11d   :  { %149 = vsyncpa [#allocation4], 1 }

</bundles_post_ra>
